<compile_context>
chip_gen: v7x
topology: tpu7x:2x2x1
jax: 0.10.0
libtpu: 0.0.40
codegen_flags: <defaults>
</compile_context>

<pallas_src>
import functools
import math

import numpy as np
import jax
import jax.numpy as jnp
from jax.experimental import pallas as pl
from jax.experimental.pallas import tpu as pltpu

LANE = 128


def _round_up(x, m):
    return (x + m - 1) // m * m


def _head_tail_kernel(emb_ref, pmask_ref, wso_ref, bso_ref,
                      w1_ref, b1_ref, w2_ref, b2_ref, out_ref):
    f32 = jnp.float32
    cdt = wso_ref.dtype                      # matmul operand dtype (f32 or bf16)

    e = emb_ref[...].astype(f32)             # (TB, L, D)
    TB, L, D = e.shape
    H2 = wso_ref.shape[1]                    # 2*H  (fused [subject | object] conv)
    H = H2 // 2

    # ---- 3-tap conv over L == three accumulated matmuls on shifted token views ----
    # (replaces the (B, L, 3D) lane-axis im2col concat: no XLU relayout, ~3x less
    #  activation footprint).  The zero row implements Conv2d padding=(1, 0) along L.
    zrow = jnp.zeros((TB, 1, D), f32)
    e_prev = jnp.concatenate([zrow, e[:, :-1, :]], axis=1)   # token l-1 (zero at l=0)
    e_next = jnp.concatenate([e[:, 1:, :], zrow], axis=1)    # token l+1 (zero at l=L-1)

    w_tap0 = wso_ref[0:D, :]                 # conv tap multiplying token l-1
    w_tap1 = wso_ref[D:2 * D, :]             # token l
    w_tap2 = wso_ref[2 * D:3 * D, :]         # token l+1

    def mm(a, w):                            # (TB*L, D) @ (D, 2H) on the MXU, f32 accum
        return jnp.dot(a.reshape(TB * L, D).astype(cdt), w,
                       preferred_element_type=f32)

    conv = mm(e_prev, w_tap0) + mm(e, w_tap1) + mm(e_next, w_tap2)
    conv = conv + bso_ref[...].astype(f32)   # (TB*L, 2H)
    conv = conv.reshape(TB, L, H2)
    conv_s = conv[:, :, :H]                  # subject branch
    conv_o = conv[:, :, H:]                  # object branch

    # ---- _MPiecewisePooling: piecewise max over L via the "+mask ... -100" trick ----
    pm = pmask_ref[...].astype(f32)          # (TB, L, 4) = [s_p0, s_p1, o_p0, o_p1]
    s0 = jnp.max(conv_s + pm[:, :, 0:1], axis=1)      # (TB, H)
    s1 = jnp.max(conv_s + pm[:, :, 1:2], axis=1)
    o0 = jnp.max(conv_o + pm[:, :, 2:3], axis=1)
    o1 = jnp.max(conv_o + pm[:, :, 3:4], axis=1)

    # Block order [s0 | s1 | o0 | o1] -> 4H = 128 lanes (aligned).  PyTorch's interleaved
    # .view()/.cat() ordering is folded into the pre-permuted rows of w1 (one-time prep).
    feats = jnp.concatenate([s0, s1, o0, o1], axis=-1) - 100.0
    feats = jnp.maximum(feats, 0.0)          # ReLU applied to each _SOCNN output

    h1 = jnp.dot(feats.astype(cdt), w1_ref[...],
                 preferred_element_type=f32) + b1_ref[...].astype(f32)
    h1 = jnp.maximum(h1, 0.0)
    h2 = jnp.dot(h1.astype(cdt), w2_ref[...],
                 preferred_element_type=f32) + b2_ref[...].astype(f32)
    h2 = jnp.maximum(h2, 0.0)
    out_ref[...] = h2.astype(out_ref.dtype)  # lane-dense 128-wide padded store


def prepare_params(params, *, compute_dtype=jnp.float32):
    """One-time, device-side conversion of PyTorch-layout parameters to kernel layout.

    Hoisted out of the per-call path: no per-call reshapes/transposes and no host
    round-trip for the w1 row permutation.
    """
    f32 = jnp.float32
    wc_s = jnp.asarray(params["wc_s"], f32)       # (H, 1, 3, D) Conv2d weight
    wc_o = jnp.asarray(params["wc_o"], f32)
    H, _, _, D = wc_s.shape

    # Conv2d (H, 1, 3, D) -> (3D, H), row index = tap*D + d; fuse subject|object along
    # the output (lane) axis -> (3D, 2H).
    ws = wc_s.reshape(H, 3 * D).T
    wo = wc_o.reshape(H, 3 * D).T
    w_so = jnp.concatenate([ws, wo], axis=1)                        # (3D, 2H)
    b_so = jnp.concatenate([jnp.asarray(params["bc_s"], f32).reshape(1, H),
                            jnp.asarray(params["bc_o"], f32).reshape(1, H)], axis=1)

    # Linear weights: PyTorch stores (out, in); kernel uses (in, out).  Re-order w1 rows
    # from PyTorch's interleaved soc layout (half, h, piece) to the kernel's block layout
    # (half, piece, h) with a pure device reshape/transpose (no gather, no host sync).
    w1 = jnp.asarray(params["w1"], f32).T                           # (4H, 3H)
    w1 = w1.reshape(2, H, 2, 3 * H).transpose(0, 2, 1, 3).reshape(4 * H, 3 * H)
    b1 = jnp.asarray(params["b1"], f32).reshape(1, 3 * H)

    # Pad the final layer's output lanes to a multiple of 128 so the kernel store is a
    # full unmasked 128-lane vst; the wrapper slices the real 2H columns back out.
    out_dim = 2 * H
    out_pad = _round_up(out_dim, LANE)
    w2 = jnp.asarray(params["w2"], f32).T                           # (3H, 2H)
    w2 = jnp.pad(w2, ((0, 0), (0, out_pad - out_dim)))
    b2 = jnp.pad(jnp.asarray(params["b2"], f32).reshape(1, out_dim),
                 ((0, 0), (0, out_pad - out_dim)))

    return {
        "w_so": w_so.astype(compute_dtype),   # matmul operands (bf16 on v6e/v7x for MXU peak)
        "b_so": b_so,                         # biases stay f32 (added after f32 accumulate)
        "w1": w1.astype(compute_dtype),
        "b1": b1,
        "w2": w2.astype(compute_dtype),
        "b2": b2,
    }


@functools.partial(jax.jit, static_argnames=("batch_tile",))
def head_tail_cnn(emb, mask, prepped, *, batch_tile=None):
    """Jit-compiled forward. `prepped` comes from prepare_params (one-time)."""
    B, L, D = emb.shape
    H = prepped["w_so"].shape[1] // 2
    out_pad = prepped["w2"].shape[1]

    # Precompute the four per-piece pooling masks once in XLA (hoisted out of the kernel):
    # subject: [p0, p1+p2]; object: [p0+p1, p2].
    m = mask.astype(jnp.float32)
    pmask = jnp.stack([m[:, :, 0], m[:, :, 1] + m[:, :, 2],
                       m[:, :, 0] + m[:, :, 1], m[:, :, 2]], axis=-1)   # (B, L, 4)

    tb = B if batch_tile is None else batch_tile
    grid = (pl.cdiv(B, tb),)

    def full(a):
        n = a.ndim
        return pl.BlockSpec(a.shape, lambda i: (0,) * n)

    out = pl.pallas_call(
        _head_tail_kernel,
        out_shape=jax.ShapeDtypeStruct((B, out_pad), jnp.float32),
        grid=grid,
        in_specs=[
            pl.BlockSpec((tb, L, D), lambda i: (i, 0, 0)),     # embedding (batch-tiled)
            pl.BlockSpec((tb, L, 4), lambda i: (i, 0, 0)),     # precomputed piece masks
            full(prepped["w_so"]), full(prepped["b_so"]),      # fused subject|object conv
            full(prepped["w1"]), full(prepped["b1"]),          # ffn1 (rows pre-permuted)
            full(prepped["w2"]), full(prepped["b2"]),          # ffn2 (lane-padded)
        ],
        out_specs=pl.BlockSpec((tb, out_pad), lambda i: (i, 0)),
        compiler_params=pltpu.CompilerParams(
            dimension_semantics=("parallel",)),                # shards across TCs on v7x
    )(emb, pmask, prepped["w_so"], prepped["b_so"],
      prepped["w1"], prepped["b1"], prepped["w2"], prepped["b2"])
    return out[:, :2 * H]


def reference_forward(emb, mask, p):
    """Pure-JAX mirror of the PyTorch forward (for correctness checking)."""
    hp = jax.lax.Precision.HIGHEST

    def socnn(emb, mask, wc, bc, is_head):
        x = emb[:, None, :, :]                                   # (B, 1, L, D)
        out = jax.lax.conv_general_dilated(
            x, wc, window_strides=(1, 1), padding=((1, 1), (0, 0)),
            dimension_numbers=("NCHW", "OIHW", "NCHW"), precision=hp)
        out = out + bc[None, :, None, None]                      # (B, H, L, 1)
        if is_head:
            part = jnp.stack([mask[:, :, 0], mask[:, :, 1] + mask[:, :, 2]], axis=0)
        else:
            part = jnp.stack([mask[:, :, 0] + mask[:, :, 1], mask[:, :, 2]], axis=0)
        part = jnp.transpose(part, (1, 2, 0))[:, None, :, :]     # (B, 1, L, 2)
        z = jnp.max(part + out, axis=2) - 100.0                  # (B, H, 2)
        z = z.reshape(z.shape[0], -1)                            # (B, 2H) interleaved
        return jax.nn.relu(z)

    sbj = socnn(emb, mask, p["wc_s"], p["bc_s"], True)
    obj = socnn(emb, mask, p["wc_o"], p["bc_o"], False)
    soc = jnp.concatenate([sbj, obj], axis=1)
    soc = jax.nn.relu(jnp.dot(soc, p["w1"].T, precision=hp) + p["b1"])
    return jax.nn.relu(jnp.dot(soc, p["w2"].T, precision=hp) + p["b2"])


if __name__ == "__main__":
    # Small shapes implied by the module: model_dim=D, hidden_size=H, seq=L, batch=B.
    B, L, D, H = 2, 16, 32, 32

    key = jax.random.PRNGKey(0)
    (k_emb, k_ws, k_bs, k_wo, k_bo, k_w1, k_b1, k_w2, k_b2) = jax.random.split(key, 9)

    emb = jax.random.normal(k_emb, (B, L, D), jnp.float32)

    # PCNN-style mask: each token belongs to one of 3 pieces; 100 in its piece channel.
    bounds = np.array([[5, 10], [4, 12]])
    mask_np = np.zeros((B, L, 3), np.float32)
    for b in range(B):
        for l in range(L):
            piece = 0 if l < bounds[b, 0] else (1 if l < bounds[b, 1] else 2)
            mask_np[b, l, piece] = 100.0
    mask = jnp.asarray(mask_np)

    # Deterministic parameter init in PyTorch layout (Conv2d: (H,1,3,D); Linear: (out,in)).
    cb = 1.0 / math.sqrt(1 * 3 * D)
    l1b = 1.0 / math.sqrt(4 * H)
    l2b = 1.0 / math.sqrt(3 * H)
    params = {
        "wc_s": jax.random.uniform(k_ws, (H, 1, 3, D), jnp.float32, -cb, cb),
        "bc_s": jax.random.uniform(k_bs, (H,), jnp.float32, -cb, cb),
        "wc_o": jax.random.uniform(k_wo, (H, 1, 3, D), jnp.float32, -cb, cb),
        "bc_o": jax.random.uniform(k_bo, (H,), jnp.float32, -cb, cb),
        "w1": jax.random.uniform(k_w1, (3 * H, 4 * H), jnp.float32, -l1b, l1b),
        "b1": jax.random.uniform(k_b1, (3 * H,), jnp.float32, -l1b, l1b),
        "w2": jax.random.uniform(k_w2, (2 * H, 3 * H), jnp.float32, -l2b, l2b),
        "b2": jax.random.uniform(k_b2, (2 * H,), jnp.float32, -l2b, l2b),
    }
    # Note: the surrounding module's nn.Dropout is declared but never called -> no-op.

    ref = jax.block_until_ready(reference_forward(emb, mask, params))

    # f32 matmul operands (default): tight check against the HIGHEST-precision reference.
    prepped_f32 = prepare_params(params)                     # one-time weight prep
    out = jax.block_until_ready(head_tail_cnn(emb, mask, prepped_f32))
    assert out.shape == (B, 2 * H), out.shape
    np.testing.assert_allclose(np.asarray(out), np.asarray(ref), rtol=1e-3, atol=1e-3)

    # bf16 matmul operands + f32 accumulation (v6e/v7x MXU path): looser tolerance.
    prepped_bf16 = prepare_params(params, compute_dtype=jnp.bfloat16)
    out_bf16 = jax.block_until_ready(head_tail_cnn(emb, mask, prepped_bf16))
    np.testing.assert_allclose(np.asarray(out_bf16), np.asarray(ref), rtol=5e-2, atol=5e-2)

    print("KERNEL_OK")
</pallas_src>

<mosaic_0001>
module attributes {stable_mosaic.version = 11 : i64} {
  func.func @_head_tail_kernel(%arg0: i32, %arg1: memref<2x16x32xf32, #tpu.memory_space<vmem>>, %arg2: memref<2x16x4xf32, #tpu.memory_space<vmem>>, %arg3: memref<96x64xf32, #tpu.memory_space<vmem>>, %arg4: memref<1x64xf32, #tpu.memory_space<vmem>>, %arg5: memref<128x96xf32, #tpu.memory_space<vmem>>, %arg6: memref<1x96xf32, #tpu.memory_space<vmem>>, %arg7: memref<96x128xf32, #tpu.memory_space<vmem>>, %arg8: memref<1x128xf32, #tpu.memory_space<vmem>>, %arg9: memref<2x128xf32, #tpu.memory_space<vmem>>) attributes {dimension_semantics = [#tpu.dimension_semantics<parallel>], iteration_bounds = array<i64: 1>, scalar_prefetch = 0 : i64, scratch_operands = 0 : i64, tpu.core_type = #tpu.core_type<tc>, window_params = [{transform_indices = @transform_0, window_bounds = array<i64: 2, 16, 32>}, {transform_indices = @transform_1, window_bounds = array<i64: 2, 16, 4>}, {pipeline_mode = #tpu.pipeline_mode<synchronous>, transform_indices = @transform_2, window_bounds = array<i64: 96, 64>}, {pipeline_mode = #tpu.pipeline_mode<synchronous>, transform_indices = @transform_3, window_bounds = array<i64: 1, 64>}, {pipeline_mode = #tpu.pipeline_mode<synchronous>, transform_indices = @transform_4, window_bounds = array<i64: 128, 96>}, {pipeline_mode = #tpu.pipeline_mode<synchronous>, transform_indices = @transform_5, window_bounds = array<i64: 1, 96>}, {pipeline_mode = #tpu.pipeline_mode<synchronous>, transform_indices = @transform_6, window_bounds = array<i64: 96, 128>}, {pipeline_mode = #tpu.pipeline_mode<synchronous>, transform_indices = @transform_7, window_bounds = array<i64: 1, 128>}, {transform_indices = @transform_8, window_bounds = array<i64: 2, 128>}]} {
    %c0 = arith.constant 0 : index
    %c0_0 = arith.constant 0 : index
    %c0_1 = arith.constant 0 : index
    %0 = vector.load %arg1[%c0, %c0_0, %c0_1] : memref<2x16x32xf32, #tpu.memory_space<vmem>>, vector<2x16x32xf32>
    %cst = arith.constant 0.000000e+00 : f32
    %1 = vector.broadcast %cst : f32 to vector<2x1x32xf32>
    %2 = vector.extract_strided_slice %0 {offsets = [0, 0, 0], sizes = [2, 15, 32], strides = [1, 1, 1]} : vector<2x16x32xf32> to vector<2x15x32xf32>
    %3 = tpu.concatenate %1, %2 in 1 : vector<2x1x32xf32>, vector<2x15x32xf32> -> vector<2x16x32xf32>
    %4 = vector.extract_strided_slice %0 {offsets = [0, 1, 0], sizes = [2, 15, 32], strides = [1, 1, 1]} : vector<2x16x32xf32> to vector<2x15x32xf32>
    %5 = tpu.concatenate %4, %1 in 1 : vector<2x15x32xf32>, vector<2x1x32xf32> -> vector<2x16x32xf32>
    %c0_2 = arith.constant 0 : index
    %c0_3 = arith.constant 0 : index
    %6 = vector.load %arg3[%c0_2, %c0_3] : memref<96x64xf32, #tpu.memory_space<vmem>>, vector<32x64xf32>
    %c32 = arith.constant 32 : index
    %c0_4 = arith.constant 0 : index
    %7 = vector.load %arg3[%c32, %c0_4] : memref<96x64xf32, #tpu.memory_space<vmem>>, vector<32x64xf32>
    %c64 = arith.constant 64 : index
    %c0_5 = arith.constant 0 : index
    %8 = vector.load %arg3[%c64, %c0_5] : memref<96x64xf32, #tpu.memory_space<vmem>>, vector<32x64xf32>
    %9 = vector.shape_cast %3 : vector<2x16x32xf32> to vector<32x32xf32>
    %cst_6 = arith.constant dense<0.000000e+00> : vector<32x64xf32>
    %10 = tpu.matmul %9, %6, %cst_6 {dimension_numbers = #tpu.dot_dimension_numbers<[1], [0], [0], [1], [0, 0, 1, 1], [], []>} : vector<32x32xf32>, vector<32x64xf32>, vector<32x64xf32> -> vector<32x64xf32>
    %11 = vector.shape_cast %0 : vector<2x16x32xf32> to vector<32x32xf32>
    %cst_7 = arith.constant dense<0.000000e+00> : vector<32x64xf32>
    %12 = tpu.matmul %11, %7, %cst_7 {dimension_numbers = #tpu.dot_dimension_numbers<[1], [0], [0], [1], [0, 0, 1, 1], [], []>} : vector<32x32xf32>, vector<32x64xf32>, vector<32x64xf32> -> vector<32x64xf32>
    %13 = arith.addf %10, %12 : vector<32x64xf32>
    %14 = vector.shape_cast %5 : vector<2x16x32xf32> to vector<32x32xf32>
    %cst_8 = arith.constant dense<0.000000e+00> : vector<32x64xf32>
    %15 = tpu.matmul %14, %8, %cst_8 {dimension_numbers = #tpu.dot_dimension_numbers<[1], [0], [0], [1], [0, 0, 1, 1], [], []>} : vector<32x32xf32>, vector<32x64xf32>, vector<32x64xf32> -> vector<32x64xf32>
    %16 = arith.addf %13, %15 : vector<32x64xf32>
    %c0_9 = arith.constant 0 : index
    %c0_10 = arith.constant 0 : index
    %17 = vector.load %arg4[%c0_9, %c0_10] : memref<1x64xf32, #tpu.memory_space<vmem>>, vector<1x64xf32>
    %18 = vector.broadcast %17 : vector<1x64xf32> to vector<32x64xf32>
    %19 = arith.addf %16, %18 : vector<32x64xf32>
    %20 = vector.shape_cast %19 : vector<32x64xf32> to vector<2x16x64xf32>
    %21 = vector.extract_strided_slice %20 {offsets = [0, 0, 0], sizes = [2, 16, 32], strides = [1, 1, 1]} : vector<2x16x64xf32> to vector<2x16x32xf32>
    %22 = vector.extract_strided_slice %20 {offsets = [0, 0, 32], sizes = [2, 16, 32], strides = [1, 1, 1]} : vector<2x16x64xf32> to vector<2x16x32xf32>
    %c0_11 = arith.constant 0 : index
    %c0_12 = arith.constant 0 : index
    %c0_13 = arith.constant 0 : index
    %23 = vector.load %arg2[%c0_11, %c0_12, %c0_13] : memref<2x16x4xf32, #tpu.memory_space<vmem>>, vector<2x16x4xf32>
    %24 = vector.extract_strided_slice %23 {offsets = [0, 0, 0], sizes = [2, 16, 1], strides = [1, 1, 1]} : vector<2x16x4xf32> to vector<2x16x1xf32>
    %25 = vector.broadcast %24 : vector<2x16x1xf32> to vector<2x16x32xf32>
    %26 = arith.addf %21, %25 : vector<2x16x32xf32>
    %cst_14 = arith.constant dense<0xFF800000> : vector<2x32xf32>
    %27 = vector.multi_reduction <maximumf>, %26, %cst_14 [1] : vector<2x16x32xf32> to vector<2x32xf32>
    %28 = vector.extract_strided_slice %23 {offsets = [0, 0, 1], sizes = [2, 16, 1], strides = [1, 1, 1]} : vector<2x16x4xf32> to vector<2x16x1xf32>
    %29 = vector.broadcast %28 : vector<2x16x1xf32> to vector<2x16x32xf32>
    %30 = arith.addf %21, %29 : vector<2x16x32xf32>
    %cst_15 = arith.constant dense<0xFF800000> : vector<2x32xf32>
    %31 = vector.multi_reduction <maximumf>, %30, %cst_15 [1] : vector<2x16x32xf32> to vector<2x32xf32>
    %32 = vector.extract_strided_slice %23 {offsets = [0, 0, 2], sizes = [2, 16, 1], strides = [1, 1, 1]} : vector<2x16x4xf32> to vector<2x16x1xf32>
    %33 = vector.broadcast %32 : vector<2x16x1xf32> to vector<2x16x32xf32>
    %34 = arith.addf %22, %33 : vector<2x16x32xf32>
    %cst_16 = arith.constant dense<0xFF800000> : vector<2x32xf32>
    %35 = vector.multi_reduction <maximumf>, %34, %cst_16 [1] : vector<2x16x32xf32> to vector<2x32xf32>
    %36 = vector.extract_strided_slice %23 {offsets = [0, 0, 3], sizes = [2, 16, 1], strides = [1, 1, 1]} : vector<2x16x4xf32> to vector<2x16x1xf32>
    %37 = vector.broadcast %36 : vector<2x16x1xf32> to vector<2x16x32xf32>
    %38 = arith.addf %22, %37 : vector<2x16x32xf32>
    %cst_17 = arith.constant dense<0xFF800000> : vector<2x32xf32>
    %39 = vector.multi_reduction <maximumf>, %38, %cst_17 [1] : vector<2x16x32xf32> to vector<2x32xf32>
    %40 = tpu.concatenate %27, %31, %35, %39 in 1 : vector<2x32xf32>, vector<2x32xf32>, vector<2x32xf32>, vector<2x32xf32> -> vector<2x128xf32>
    %cst_18 = arith.constant 1.000000e+02 : f32
    %41 = vector.broadcast %cst_18 : f32 to vector<2x128xf32>
    %42 = arith.subf %40, %41 : vector<2x128xf32>
    %cst_19 = arith.constant 0.000000e+00 : f32
    %43 = vector.broadcast %cst_19 : f32 to vector<2x128xf32>
    %44 = arith.maximumf %42, %43 : vector<2x128xf32>
    %c0_20 = arith.constant 0 : index
    %c0_21 = arith.constant 0 : index
    %45 = vector.load %arg5[%c0_20, %c0_21] : memref<128x96xf32, #tpu.memory_space<vmem>>, vector<128x96xf32>
    %cst_22 = arith.constant dense<0.000000e+00> : vector<2x96xf32>
    %46 = tpu.matmul %44, %45, %cst_22 {dimension_numbers = #tpu.dot_dimension_numbers<[1], [0], [0], [1], [0, 0, 1, 1], [], []>} : vector<2x128xf32>, vector<128x96xf32>, vector<2x96xf32> -> vector<2x96xf32>
    %c0_23 = arith.constant 0 : index
    %c0_24 = arith.constant 0 : index
    %47 = vector.load %arg6[%c0_23, %c0_24] : memref<1x96xf32, #tpu.memory_space<vmem>>, vector<1x96xf32>
    %48 = vector.broadcast %47 : vector<1x96xf32> to vector<2x96xf32>
    %49 = arith.addf %46, %48 : vector<2x96xf32>
    %cst_25 = arith.constant 0.000000e+00 : f32
    %50 = vector.broadcast %cst_25 : f32 to vector<2x96xf32>
    %51 = arith.maximumf %49, %50 : vector<2x96xf32>
    %c0_26 = arith.constant 0 : index
    %c0_27 = arith.constant 0 : index
    %52 = vector.load %arg7[%c0_26, %c0_27] : memref<96x128xf32, #tpu.memory_space<vmem>>, vector<96x128xf32>
    %cst_28 = arith.constant dense<0.000000e+00> : vector<2x128xf32>
    %53 = tpu.matmul %51, %52, %cst_28 {dimension_numbers = #tpu.dot_dimension_numbers<[1], [0], [0], [1], [0, 0, 1, 1], [], []>} : vector<2x96xf32>, vector<96x128xf32>, vector<2x128xf32> -> vector<2x128xf32>
    %c0_29 = arith.constant 0 : index
    %c0_30 = arith.constant 0 : index
    %54 = vector.load %arg8[%c0_29, %c0_30] : memref<1x128xf32, #tpu.memory_space<vmem>>, vector<1x128xf32>
    %55 = vector.broadcast %54 : vector<1x128xf32> to vector<2x128xf32>
    %56 = arith.addf %53, %55 : vector<2x128xf32>
    %cst_31 = arith.constant 0.000000e+00 : f32
    %57 = vector.broadcast %cst_31 : f32 to vector<2x128xf32>
    %58 = arith.maximumf %56, %57 : vector<2x128xf32>
    %c0_32 = arith.constant 0 : index
    %c0_33 = arith.constant 0 : index
    %59 = vector.load %arg9[%c0_32, %c0_33] : memref<2x128xf32, #tpu.memory_space<vmem>>, vector<2x128xf32>
    tpu.vector_store %arg9[%c0_32, %c0_33], %58 {strides = array<i32>} : memref<2x128xf32, #tpu.memory_space<vmem>>, vector<2x128xf32>,
    return
  }
  func.func @transform_0(%arg0: i32) -> (i32, i32, i32) {
    %c0_i32 = arith.constant 0 : i32
    %c0_i32_0 = arith.constant 0 : i32
    %c0_i32_1 = arith.constant 0 : i32
    return %arg0, %c0_i32, %c0_i32_0 : i32, i32, i32
  }
  func.func @transform_1(%arg0: i32) -> (i32, i32, i32) {
    %c0_i32 = arith.constant 0 : i32
    %c0_i32_0 = arith.constant 0 : i32
    %c0_i32_1 = arith.constant 0 : i32
    return %arg0, %c0_i32, %c0_i32_0 : i32, i32, i32
  }
  func.func @transform_2(%arg0: i32) -> (i32, i32) {
    %c0_i32 = arith.constant 0 : i32
    %c0_i32_0 = arith.constant 0 : i32
    %c0_i32_1 = arith.constant 0 : i32
    return %c0_i32, %c0_i32_0 : i32, i32
  }
  func.func @transform_3(%arg0: i32) -> (i32, i32) {
    %c0_i32 = arith.constant 0 : i32
    %c0_i32_0 = arith.constant 0 : i32
    %c0_i32_1 = arith.constant 0 : i32
    return %c0_i32, %c0_i32_0 : i32, i32
  }
  func.func @transform_4(%arg0: i32) -> (i32, i32) {
    %c0_i32 = arith.constant 0 : i32
    %c0_i32_0 = arith.constant 0 : i32
    %c0_i32_1 = arith.constant 0 : i32
    return %c0_i32, %c0_i32_0 : i32, i32
  }
  func.func @transform_5(%arg0: i32) -> (i32, i32) {
    %c0_i32 = arith.constant 0 : i32
    %c0_i32_0 = arith.constant 0 : i32
    %c0_i32_1 = arith.constant 0 : i32
    return %c0_i32, %c0_i32_0 : i32, i32
  }
  func.func @transform_6(%arg0: i32) -> (i32, i32) {
    %c0_i32 = arith.constant 0 : i32
    %c0_i32_0 = arith.constant 0 : i32
    %c0_i32_1 = arith.constant 0 : i32
    return %c0_i32, %c0_i32_0 : i32, i32
  }
  func.func @transform_7(%arg0: i32) -> (i32, i32) {
    %c0_i32 = arith.constant 0 : i32
    %c0_i32_0 = arith.constant 0 : i32
    %c0_i32_1 = arith.constant 0 : i32
    return %c0_i32, %c0_i32_0 : i32, i32
  }
  func.func @transform_8(%arg0: i32) -> (i32, i32) {
    %c0_i32 = arith.constant 0 : i32
    %c0_i32_0 = arith.constant 0 : i32
    return %arg0, %c0_i32 : i32, i32
  }
}

</mosaic_0001>

<bundles_post_ra>
// kernel: head_tail_cnn.1
= control target key start
LH: loop header
LB: loop body
LE: loop exit
PB: predicated region body
PF: predicated region fallthrough
CT: control target
= control target key end

     0   :  { %vm38_vm0 = vcmask 1040384   ;;  %vm72_vm1 = vcmask 261120   ;;  %v1056_v12 = vmov 1   ;;  %s1339_s0 = inlined_call_operand.vmem [shape: f32[2,16,32], index: 0, kind: input, shape index: {}]   ;;  %s1340_s1 = inlined_call_operand.vmem [shape: f32[2,16,4], index: 1, kind: input, shape index: {}]   ;;  %s1341_s2 = inlined_call_operand.vmem [shape: f32[96,64], index: 2, kind: input, shape index: {}]   ;;  %s1342_s3 = inlined_call_operand.vmem [shape: f32[1,64], index: 3, kind: input, shape index: {}]   ;;  %s1343_s4 = inlined_call_operand.vmem [shape: f32[128,96], index: 4, kind: input, shape index: {}]   ;;  %s1344_s5 = inlined_call_operand.vmem [shape: f32[1,96], index: 5, kind: input, shape index: {}]   ;;  %s1345_s6 = inlined_call_operand.vmem [shape: f32[96,128], index: 6, kind: input, shape index: {}]   ;;  %s1346_s7 = inlined_call_operand.vmem [shape: f32[1,128], index: 7, kind: input, shape index: {}]   ;;  %s1347_s8 = inlined_call_operand.hbm [shape: f32[2,128], index: 8, kind: output, shape index: {}]  }
   0x1   :  { %v60_v0 = vld [vmem:[%s1341_s2] sm:$0xff]  ;;  %v61_v1 = vld [vmem:[%s1341_s2 + $0x8] sm:$0xff]  ;;  %v62_v2 = vld [vmem:[%s1341_s2 + $0x10] sm:$0xff]  ;;  %1024 = vset.pattern.permute.xlu1 %v1056_v12  ;;  %1023 = vset.pattern.permute.xlu0 %v1056_v12 }
   0x2   :  { %v947_v3 = vpack.c.bf16 %v61_v1, %v60_v0  ;;  %v63_v4 = vld [vmem:[%s1341_s2 + $0x18] sm:$0xff]  ;;  %v30_v5 = vld [vmem:[%s1339_s0] sm:$0xff]  ;;  %v65_v9 = vld [vmem:[%s1341_s2 + $0x28] sm:$0xff] }
   0x3   :  { %v64_v6 = vld [vmem:[%s1341_s2 + $0x20] sm:$0xff]  ;;  %v951_v7 = vpack.c.bf16 %v63_v4, %v62_v2  ;;  %v39_v8 = vrot.slane %v30_v5, 7  ;;  %v31_v10 = vld [vmem:[%s1339_s0 + $0x8] sm:$0xff]  ;;  %843 = vmatprep.mubr.msk.f32.mxu1 %vm72_vm1, %v30_v5  ;;  %v32_v15 = vld [vmem:[%s1339_s0 + $0x10] sm:$0xff] }
   0x4   :  { %v68_v11 = vld [vmem:[%s1341_s2 + $0x40] sm:$0xff]  ;;  %948 = vmatprep.subr.bf16.mxu0 %v947_v3  ;;  %v939_v13 = vpack.c.bf16 %v65_v9, %v64_v6  ;;  %v69_v14 = vld [vmem:[%s1341_s2 + $0x48] sm:$0xff]  ;;  %v66_v16 = vld [vmem:[%s1341_s2 + $0x30] sm:$0xff]  ;;  %v40_v18 = vrot.slane %v31_v10, 7  ;;  %v42_v21 = vrot.slane %v32_v15, 7 }
   0x5   :  { %950 = vmatpush3.bf16.msra.mxu0 %v947_v3  ;;  %v47_v17 = vsel %vm38_vm0, 0.0, %v39_v8  ;;  %v67_v19 = vld [vmem:[%s1341_s2 + $0x38] sm:$0xff]  ;;  %v955_v20 = vpack.c.bf16 %v69_v14, %v68_v11  ;;  %v1159_v24 = vld [vmem:[%s1340_s1 + $0x10] sm:$0xff]  ;;  %v371_v27 = vld [vmem:[%s1340_s1] sm:$0xff] }
   0x6   :  { %952 = vmatprep.subr.bf16.mxu0 %v951_v7  ;;  %857 = vmatprep.mubr.msk.f32.mxu0 %vm72_vm1, %v47_v17  ;;  %v943_v22 = vpack.c.bf16 %v67_v19, %v66_v16  ;;  %v33_v23 = vld [vmem:[%s1339_s0 + $0x18] sm:$0xff]  ;;  %v70_v25 = vld [vmem:[%s1341_s2 + $0x50] sm:$0xff] }
   0x7   :  { %940 = vmatprep.subr.bf16.mxu1 %v939_v13  ;;  %v71_v26 = vld [vmem:[%s1341_s2 + $0x58] sm:$0xff]  ;;  %426 = vperm.xlu1 %1024, %v1159_v24  }
   0x8   :  { %942 = vmatpush3.bf16.msra.mxu1 %v939_v13  ;;  %v374_v28 = vld [vmem:[%s1340_s1 + $0x18] sm:$0xff]  ;;  %418 = vperm.xlu0 %1023, %v371_v27  }
   0x9   :  { %13 = vsyncpa [#allocation3], 0  ;;  %954 = vmatpush3.bf16.msra.mxu0 %v951_v7  ;;  %v41_v29 = vsel %vm38_vm0, %v39_v8, %v40_v18  ;;  %944 = vmatprep.subr.bf16.mxu1 %v943_v22  ;;  %v43_v30 = vrot.slane %v33_v23, 7  ;;  %v50_v31 = vrot.slane %v30_v5, 1  ;;  %v48_v32 = vsel %vm38_vm0, 0.0, %v42_v21  ;;  %v372_v36 = vld [vmem:[%s1340_s1 + $0x8] sm:$0xff] }
   0xa   :  { %956 = vmatprep.subr.bf16.mxu0 %v955_v20  ;;  %v959_v33 = vpack.c.bf16 %v71_v26, %v70_v25  ;;  %v51_v34 = vrot.slane %v31_v10, 1  ;;  %vm49_vm2 = vcmask 1046528   ;;  %v53_v38 = vrot.slane %v32_v15, 1  ;;  %v562_v46 = vld [vmem:[%s1343_s4] sm:$0xff]  ;;  %v563_v47 = vld [vmem:[%s1343_s4 + $0x8] sm:$0xff]  ;;  %v564_v48 = vld [vmem:[%s1343_s4 + $0x10] sm:$0xff] }
   0xb   :  { %430 = vperm.xlu1 %1024, %v374_v28   ;;  %v44_v35 = vsel %vm38_vm0, %v42_v21, %v43_v30  ;;  %v54_v39 = vrot.slane %v33_v23, 1  ;;  %v1057_v40 = vmov 2   ;;  %v1058_v44 = vmov 3   ;;  %v565_v51 = vld [vmem:[%s1343_s4 + $0x18] sm:$0xff]  ;;  %v566_v53 = vld [vmem:[%s1343_s4 + $0x20] sm:$0xff]  ;;  %v567_v54 = vld [vmem:[%s1343_s4 + $0x28] sm:$0xff] }
   0xc   :  { %858 = vmatmul.mubr.msk.f32.vlgmr.msra.gmra.mrb[0].mxu0 %vm72_vm1, %v41_v29  ;;  %946 = vmatpush3.bf16.msra.mxu1 %v943_v22  ;;  %v52_v37 = vsel %vm49_vm2, %v50_v31, %v51_v34  ;;  %v58_v41 = vsel %vm49_vm2, %v51_v34, 0.0  ;;  %v1059_v45 = vmov 0   ;;  %v1060_v49 = vmov 0.0|0.0   ;;  %v568_v56 = vld [vmem:[%s1343_s4 + $0x30] sm:$0xff]  ;;  %v569_v57 = vld [vmem:[%s1343_s4 + $0x38] sm:$0xff]  ;;  %v570_v59 = vld [vmem:[%s1343_s4 + $0x40] sm:$0xff] }
   0xd   :  { %958 = vmatpush3.bf16.msra.mxu0 %v955_v20  ;;  %860 = vmatprep.mubr.msk.f32.mxu0 %vm72_vm1, %v48_v32  ;;  %v55_v42 = vsel %vm49_vm2, %v53_v38, %v54_v39  ;;  %v59_v43 = vsel %vm49_vm2, %v54_v39, 0.0  ;;  %v964_v50 = vpack.c.bf16 %v563_v47, %v562_v46  ;;  %v967_v52 = vpack.c.bf16 %v565_v51, %v564_v48  ;;  %v571_v60 = vld [vmem:[%s1343_s4 + $0x48] sm:$0xff]  ;;  %v572_v62 = vld [vmem:[%s1343_s4 + $0x50] sm:$0xff]  ;;  %v573_v63 = vld [vmem:[%s1343_s4 + $0x58] sm:$0xff]  ;;  %s1063_s13 = smov 32   ;;  %s1064_s18 = smov 64  }
   0xe   :  { %960 = vmatprep.subr.bf16.mxu0 %v959_v33  ;;  %422 = vperm.xlu0 %1023, %v372_v36   ;;  %v970_v55 = vpack.c.bf16 %v567_v54, %v566_v53  ;;  %v973_v58 = vpack.c.bf16 %v569_v57, %v568_v56  ;;  %v976_v61 = vpack.c.bf16 %v571_v60, %v570_v59  ;;  %v776_v17 = vld [vmem:[%s1342_s3] ss:$0 sm:$0xff]  ;;  %vm475_vm3 = vcmask 523520   ;;  %s1065_s30 = smov [#allocation2]  }
   0xf   :  { %844 = vmatmul.mubr.msk.f32.vlgmr.msra.gmra.mrb[0].mxu1 %vm72_vm1, %v31_v10  ;;  %1026 = vset.pattern.permute.xlu1 %v1057_v40  ;;  %v979_v0 = vpack.c.bf16 %v573_v63, %v572_v62  ;;  %vm534_vm4 = vcmask 1041409   ;;  %vm1061_vm5 = vmmov 0   ;;  %vm556_vm6 = vcmask 523264   ;;  %s756_s9 = sshll.u32 %s1065_s30, 4  ;;  %s757_s9 = int_to_ptr.vmem [resolvable:$true] %s756_s9 }
  0x10   :  { %861 = vmatmul.mubr.msk.f32.gmra.mrb[2].mxu0 %vm72_vm1, %v44_v35  ;;  %846 = vmatprep.mubr.msk.f32.mxu1 %vm72_vm1, %v32_v15  ;;  %vm558_vm7 = vcmask 785408   ;;  %p1037_p1 = scmp.lt.s32.totalorder %s757_s9, %s757_s9 }
  0x11   :  { %962 = vmatpush3.bf16.msra.mxu0 %v959_v33  ;;  %871 = vmatprep.mubr.msk.f32.mxu0 %vm72_vm1, %v52_v37 }
  0x12   :  { %460 = vperm.xlu1 %1026, %v372_v36   ;;  %1025 = vset.pattern.permute.xlu0 %v1057_v40 }
  0x13   :  { %847 = vmatmul.mubr.msk.f32.gmra.mrb[2].mxu1 %vm72_vm1, %v33_v23  ;;  %456 = vperm.xlu0 %1025, %v371_v27  }
  0x14   :  { %872 = vmatmul.mubr.msk.f32.vlgmr.msra.gmra.mrb[0].mxu0 %vm72_vm1, %v58_v41  ;;  %963 = vmatprep.subr.bf16.mxu1 %v1060_v49 }
  0x15   :  { %874 = vmatprep.mubr.msk.f32.mxu0 %vm72_vm1, %v55_v42  ;;  %987 = vmatprep.subr.bf16.mxu0 %v1060_v49 }
  0x16   :  { %464 = vperm.xlu1 %1026, %v1159_v24   ;;  %965 = vmatpush3.bf16.msra.mxu1 %v964_v50 }
  0x17   :  { %468 = vperm.xlu0 %1025, %v374_v28   ;;  %966 = vmatprep.subr.bf16.mxu1 %v1060_v49 }
  0x18   :  { %875 = vmatmul.mubr.msk.f32.gmra.mrb[2].mxu0 %vm72_vm1, %v59_v43 }
  0x1a   :  { %1027 = vset.pattern.permute.xlu1 %v1058_v44  ;;  %968 = vmatpush3.bf16.msra.mxu1 %v967_v52 }
  0x1b   :  { %495 = vperm.xlu1 %1027, %v371_v27   ;;  %1028 = vset.pattern.permute.xlu0 %v1058_v44 }
  0x1c   :  { %499 = vperm.xlu0 %1028, %v372_v36   ;;  %969 = vmatprep.subr.bf16.mxu1 %v1060_v49 }
  0x1e   :  { %971 = vmatpush3.bf16.msra.mxu1 %v970_v55 }
  0x1f   :  { %503 = vperm.xlu1 %1027, %v1159_v24   ;;  %972 = vmatprep.subr.bf16.mxu1 %v1060_v49 }
  0x20   :  { %1029 = vset.pattern.permute.xlu0 %v1059_v45 }
  0x21   :  { %377 = vperm.xlu0 %1029, %v371_v27  }
  0x22   :  { %974 = vmatpush3.bf16.msra.mxu1 %v973_v58 }
  0x23   :  { %507 = vperm.xlu1 %1027, %v374_v28   ;;  %975 = vmatprep.subr.bf16.mxu1 %v1060_v49 }
  0x25   :  { %392 = vperm.xlu0 %1029, %v374_v28  }
  0x26   :  { %977 = vmatpush3.bf16.msra.mxu1 %v976_v61 }
  0x27   :  { %1030 = vset.pattern.permute.xlu1 %v1059_v45  ;;  %978 = vmatprep.subr.bf16.mxu1 %v1060_v49 }
  0x28   :  { %382 = vperm.xlu1 %1030, %v372_v36  }
  0x29   :  { %1031 = vset.pattern.permute.xlu0 %v1058_v44 }
  0x2a   :  { %980 = vmatpush3.bf16.msra.mxu1 %v979_v0 }
  0x2b   :  { %981 = vmatprep.subr.bf16.mxu1 %v1060_v49 }
  0x2c   :  { %387 = vperm.xlu1 %1030, %v1159_v24  }
  0x86   :  { %v427_v1 = vpop.permute.xlu1 %426 }
  0x87   :  { %v419_v4 = vpop.permute.xlu0 %418 }
  0x8a   :  { %v431_v2 = vpop.permute.xlu1 %430 }
  0x8d   :  { %v423_v6 = vpop.permute.xlu0 %422 }
  0x91   :  { %v461_v3 = vpop.permute.xlu1 %460 }
  0x92   :  { %v457_v8 = vpop.permute.xlu0 %456 }
  0x95   :  { %v465_v5 = vpop.permute.xlu1 %464 }
  0x96   :  { %v469_v10 = vpop.permute.xlu0 %468 }
  0x9a   :  { %v496_v7 = vpop.permute.xlu1 %495 }
  0x9b   :  { %v500_v14 = vpop.permute.xlu0 %499 }
  0x9e   :  { %v504_v9 = vpop.permute.xlu1 %503 }
  0xa0   :  { %v378_v24 = vpop.permute.xlu0 %377 }
  0xa2   :  { %v508_v12 = vpop.permute.xlu1 %507 }
  0xa4   :  { %v393_v54 = vpop.permute.xlu0 %392 }
  0xa7   :  { %v383_v22 = vpop.permute.xlu1 %382 }
  0xe2   :  { %v845_v11 = vpop.f32.mrb[0].mxu1 }
  0xe3   :  { %v147_v13 = vpop.f32.mrb[1].mxu1 }
  0xe6   :  { %v848_v15 = vpop.f32.mrb[2].mxu1 }
  0xe7   :  { %v873_v16 = vpop.f32.mrb[0].mxu0  ;;  %v157_v18 = vpop.f32.mrb[3].mxu1 }
  0xe8   :  { %v1005_v19 = vadd.f32 %v873_v16, %v845_v11  ;;  %v337_v20 = vpop.f32.mrb[1].mxu0 }
  0xe9   :  { %v1006_v21 = vadd.f32 %v337_v20, %v147_v13 }
  0xea   :  { %v368_v23 = vadd.f32 %v1005_v19, %v776_v17 }
  0xeb   :  { %v367_v25 = vadd.f32 %v1006_v21, %v776_v17  ;;  %v876_v26 = vpop.f32.mrb[2].mxu0 }
  0xec   :  { %v434_v27 = vadd.f32 %v423_v6, %v368_v23  ;;  %v472_v28 = vadd.f32 %v461_v3, %v368_v23  ;;  %v511_v29 = vadd.f32 %v500_v14, %v368_v23  ;;  %v396_v30 = vadd.f32 %v383_v22, %v368_v23  ;;  %v347_v31 = vpop.f32.mrb[3].mxu0 }
  0xed   :  { %v433_v32 = vadd.f32 %v419_v4, %v367_v25  ;;  %v471_v33 = vadd.f32 %v457_v8, %v367_v25  ;;  %v510_v34 = vadd.f32 %v496_v7, %v367_v25  ;;  %v395_v35 = vadd.f32 %v378_v24, %v367_v25  ;;  %v388_v4 = vpop.permute.xlu1 %387  ;;  %v574_v25 = vld [vmem:[%s1343_s4 + $0x60] sm:$0xff] }
  0xee   :  { %v438_v36 = vsel %vm72_vm1, %v434_v27, -inf  ;;  %v477_v37 = vsel %vm475_vm3, %v472_v28, -inf  ;;  %v515_v38 = vsel %vm475_vm3, %v511_v29, -inf  ;;  %v400_v39 = vsel %vm72_vm1, %v396_v30, -inf }
  0xef   :  { %v437_v40 = vsel %vm72_vm1, %v433_v32, -inf  ;;  %v476_v41 = vsel %vm475_vm3, %v471_v33, -inf  ;;  %v514_v42 = vsel %vm475_vm3, %v510_v34, -inf  ;;  %v399_v43 = vsel %vm72_vm1, %v395_v35, -inf }
  0xf0   :  { %v401_v44 = vmax.f32 %v399_v43, %v400_v39  ;;  %v1007_v45 = vadd.f32 %v876_v26, %v848_v15  ;;  %v1008_v46 = vadd.f32 %v347_v31, %v157_v18  ;;  %v478_v47 = vmax.f32 %v476_v41, %v477_v37  ;;  %v575_v26 = vld [vmem:[%s1343_s4 + $0x68] sm:$0xff]  ;;  %v576_v43 = vld [vmem:[%s1343_s4 + $0x70] sm:$0xff] }
  0xf1   :  { %v439_v48 = vmax.f32 %v437_v40, %v438_v36  ;;  %v516_v50 = vmax.f32 %v514_v42, %v515_v38  ;;  %v982_v37 = vpack.c.bf16 %v575_v26, %v574_v25 }
  0xf2   :  { %v402_v51 = vrot.slane %v401_v44, 4  ;;  %v370_v52 = vadd.f32 %v1007_v45, %v776_v17  ;;  %v369_v53 = vadd.f32 %v1008_v46, %v776_v17  ;;  %v479_v55 = vrot.slane %v478_v47, 4 }
  0xf3   :  { %v440_v56 = vrot.slane %v439_v48, 4  ;;  %v517_v57 = vrot.slane %v516_v50, 4  ;;  %983 = vmatpush3.bf16.msra.mxu1 %v982_v37  ;;  %v779_v37 = vld [vmem:[%s1346_s7] ss:$0 sm:$0xff] }
  0xf4   :  { %v403_v58 = vmax.f32 %v401_v44, %v402_v51  ;;  %v436_v59 = vadd.f32 %v431_v2, %v370_v52  ;;  %v474_v60 = vadd.f32 %v469_v10, %v370_v52  ;;  %v513_v61 = vadd.f32 %v508_v12, %v370_v52  ;;  %v577_v44 = vld [vmem:[%s1343_s4 + $0x78] sm:$0xff]  ;;  %984 = vmatprep.subr.bf16.mxu1 %v1060_v49 }
  0xf5   :  { %v435_v62 = vadd.f32 %v427_v1, %v369_v53  ;;  %v473_v63 = vadd.f32 %v465_v5, %v369_v53  ;;  %v512_v0 = vadd.f32 %v504_v9, %v369_v53  ;;  %v398_v3 = vadd.f32 %v393_v54, %v370_v52 }
  0xf6   :  { %v447_v6 = vsel %vm72_vm1, %v436_v59, -inf  ;;  %v486_v7 = vsel %vm475_vm3, %v474_v60, -inf  ;;  %v524_v8 = vsel %vm475_vm3, %v513_v61, -inf  ;;  %v404_v11 = vrot.slane %v403_v58, 2  ;;  %v656_v60 = vld [vmem:[%s1345_s6] sm:$0xff]  ;;  %v657_v61 = vld [vmem:[%s1345_s6 + $0x8] sm:$0xff] }
  0xf7   :  { %v446_v13 = vsel %vm72_vm1, %v435_v62, -inf  ;;  %v485_v14 = vsel %vm475_vm3, %v473_v63, -inf  ;;  %v523_v2 = vsel %vm475_vm3, %v512_v0, -inf  ;;  %v409_v10 = vsel %vm72_vm1, %v398_v3, -inf  ;;  %v658_v62 = vld [vmem:[%s1345_s6 + $0x10] sm:$0xff] }
  0xf8   :  { %v397_v1 = vadd.f32 %v388_v4, %v369_v53  ;;  %v480_v5 = vmax.f32 %v478_v47, %v479_v55  ;;  %v487_v9 = vmax.f32 %v485_v14, %v486_v7  ;;  %v441_v12 = vmax.f32 %v439_v48, %v440_v56 }
  0xf9   :  { %v448_v15 = vmax.f32 %v446_v13, %v447_v6  ;;  %v518_v16 = vmax.f32 %v516_v50, %v517_v57  ;;  %v525_v17 = vmax.f32 %v523_v2, %v524_v8  ;;  %v405_v30 = vmax.f32 %v403_v58, %v404_v11  ;;  %v659_v6 = vld [vmem:[%s1345_s6 + $0x18] sm:$0xff] }
  0xfa   :  { %v408_v18 = vsel %vm72_vm1, %v397_v1, -inf  ;;  %v481_v19 = vrot.slane %v480_v5, 2  ;;  %v488_v20 = vrot.slane %v487_v9, 4  ;;  %v442_v22 = vrot.slane %v441_v12, 2 }
  0xfb   :  { %v410_v21 = vmax.f32 %v408_v18, %v409_v10  ;;  %v449_v23 = vrot.slane %v448_v15, 4  ;;  %v519_v24 = vrot.slane %v518_v16, 2  ;;  %v526_v29 = vrot.slane %v525_v17, 4 }
  0xfc   :  { %v482_v27 = vmax.f32 %v480_v5, %v481_v19  ;;  %v489_v28 = vmax.f32 %v487_v9, %v488_v20  ;;  %v443_v32 = vmax.f32 %v441_v12, %v442_v22  ;;  %v406_v45 = vrot.slane %v405_v30, 1  ;;  %v660_v5 = vld [vmem:[%s1345_s6 + $0x20] sm:$0xff]  ;;  %v661_v9 = vld [vmem:[%s1345_s6 + $0x28] sm:$0xff] }
  0xfd   :  { %v411_v31 = vrot.slane %v410_v21, 4  ;;  %v450_v33 = vmax.f32 %v448_v15, %v449_v23  ;;  %v520_v35 = vmax.f32 %v518_v16, %v519_v24  ;;  %v527_v36 = vmax.f32 %v525_v17, %v526_v29  ;;  %v662_v16 = vld [vmem:[%s1345_s6 + $0x30] sm:$0xff]  ;;  %v663_v17 = vld [vmem:[%s1345_s6 + $0x38] sm:$0xff]  ;;  %v664_v19 = vld [vmem:[%s1345_s6 + $0x40] sm:$0xff] }
  0xfe   :  { %v490_v34 = vrot.slane %v489_v28, 2  ;;  %v483_v40 = vrot.slane %v482_v27, 1  ;;  %v444_v47 = vrot.slane %v443_v32, 1  ;;  %v985_v53 = vpack.c.bf16 %v577_v44, %v576_v43  ;;  %v665_v20 = vld [vmem:[%s1345_s6 + $0x48] sm:$0xff] }
  0xff   :  { %v412_v38 = vmax.f32 %v410_v21, %v411_v31  ;;  %v451_v39 = vrot.slane %v450_v33, 2  ;;  %v528_v42 = vrot.slane %v527_v36, 2  ;;  %v521_v51 = vrot.slane %v520_v35, 1 }
 0x100   :  { %v491_v41 = vmax.f32 %v489_v28, %v490_v34  ;;  %v484_v56 = vmax.f32 %v482_v27, %v483_v40  ;;  %986 = vmatpush3.bf16.msra.mxu1 %v985_v53  ;;  %v1062_v59 = vmov 0.0   ;;  %v445_v0 = vmax.f32 %v443_v32, %v444_v47  ;;  %v778_v32 = vld [vmem:[%s1344_s5] ss:$0 sm:$0xff] }
 0x101   :  { %v413_v46 = vrot.slane %v412_v38, 2  ;;  %v452_v48 = vmax.f32 %v450_v33, %v451_v39  ;;  %v529_v52 = vmax.f32 %v527_v36, %v528_v42  ;;  %909 = vmatprep.mubr.msk.f32.mxu1 %vm1061_vm5, %v1062_v59  ;;  %v988_v4 = vpack.c.bf16 %v657_v61, %v656_v60  ;;  %936 = vmatprep.mubr.msk.f32.mxu0 %vm1061_vm5, %v1062_v59 }
 0x102   :  { %v492_v50 = vrot.slane %v491_v41, 1  ;;  %v522_v8 = vmax.f32 %v520_v35, %v521_v51  ;;  %v407_v13 = vmax.f32 %v405_v30, %v406_v45  ;;  %v991_v10 = vpack.c.bf16 %v659_v6, %v658_v62  ;;  %v666_v30 = vld [vmem:[%s1345_s6 + $0x50] sm:$0xff] }
 0x103   :  { %v414_v54 = vmax.f32 %v412_v38, %v413_v46  ;;  %v453_v55 = vrot.slane %v452_v48, 1  ;;  %v530_v58 = vrot.slane %v529_v52, 1  ;;  %989 = vmatpush3.bf16.msra.mxu0 %v988_v4  ;;  %v994_v15 = vpack.c.bf16 %v661_v9, %v660_v5 }
 0x104   :  { %v493_v57 = vmax.f32 %v491_v41, %v492_v50  ;;  %990 = vmatprep.subr.bf16.mxu0 %v1060_v49  ;;  %v997_v18 = vpack.c.bf16 %v663_v17, %v662_v16  ;;  %v1000_v21 = vpack.c.bf16 %v665_v20, %v664_v19 }
 0x105   :  { %v415_v63 = vrot.slane %v414_v54, 1  ;;  %v454_v3 = vmax.f32 %v452_v48, %v453_v55  ;;  %v531_v11 = vmax.f32 %v529_v52, %v530_v58 }
 0x106   :  { %v545_v7 = vsel %vm534_vm4, %v493_v57, %v484_v56 }
 0x107   :  { %546 = vrot.lane.b32.xlu0 %v545_v7, %s1063_s13  ;;  %v539_v14 = vsel %vm534_vm4, %v454_v3, %v445_v0  ;;  %v416_v2 = vmax.f32 %v414_v54, %v415_v63  ;;  %v551_v1 = vsel %vm534_vm4, %v531_v11, %v522_v8  ;;  %992 = vmatpush3.bf16.msra.mxu0 %v991_v10 }
 0x108   :  { %540 = vrot.lane.b32.xlu1 %v539_v14, %s1063_s13  ;;  %993 = vmatprep.subr.bf16.mxu0 %v1060_v49 }
 0x109   :  { %v535_v12 = vsel %vm534_vm4, %v416_v2, %v407_v13 }
 0x10b   :  { %995 = vmatpush3.bf16.msra.mxu0 %v994_v15 }
 0x10c   :  { %552 = vrot.lane.b32.xlu1 %v551_v1, %s1064_s18  ;;  %996 = vmatprep.subr.bf16.mxu0 %v1060_v49 }
 0x10f   :  { %998 = vmatpush3.bf16.msra.mxu0 %v997_v18 }
 0x110   :  { %999 = vmatprep.subr.bf16.mxu0 %v1060_v49 }
 0x113   :  { %1001 = vmatpush3.bf16.msra.mxu0 %v1000_v21 }
 0x114   :  { %1002 = vmatprep.subr.bf16.mxu0 %v1060_v49  ;;  %v667_v49 = vld [vmem:[%s1345_s6 + $0x58] sm:$0xff]  ;;  %s1032_s6 = scalar_lea.vmem %s757_s9, 32 }
 0x115   :  { %v1003_v31 = vpack.c.bf16 %v667_v49, %v666_v30  ;;  %p1033_p0 = scmp.ne.s32.totalorder %s757_s9, %s1032_s6  ;;  %p1038_p2 = scmp.lt.s32.totalorder %s1032_s6, %s1032_s6 }
 0x117   :  { %1004 = vmatpush3.bf16.msra.mxu0 %v1003_v31  ;;  %p1039_p3 = por %p1038_p2, %p1037_p1 }
 0x119   :  { %p1040_p4 = pnand %p1039_p3, %p1033_p0 }
 0x179   :  { %v547_v23 = vpop.permute.xlu0 %546 }
 0x17a   :  { %v541_v22 = vpop.permute.xlu1 %540 }
 0x17b   :  { %v555_v24 = vsel %vm72_vm1, %v535_v12, %v541_v22 }
 0x17c   :  { %v557_v26 = vsel %vm556_vm6, %v555_v24, %v547_v23 }
 0x17e   :  { %v553_v25 = vpop.permute.xlu1 %552 }
 0x17f   :  { %v559_v27 = vsel %vm558_vm7, %v557_v26, %v553_v25 }
 0x180   :  { %v777_v28 = vadd.f32 -100.0, %v559_v27 }
 0x182   :  { %v561_v29 = vmax.f32 %v777_v28, 0.0 }
 0x184   :  { %910 = vmatmul.mubr.f32.vlgmr.msra.gmra.mrb[4].mxu1 %v561_v29 }
 0x257   :  { %v651_v33 = vpop.f32.mrb[4].mxu1 }
 0x258   :  { %v652_v34 = vadd.f32 %v778_v32, %v651_v33  ;;  %v911_v35 = vpop.f32.mrb[5].mxu1 }
 0x25a   :  { %v655_v36 = vmax.f32 %v652_v34, 0.0 }
 0x25c   :  { %937 = vmatmul.mubr.msk.f32.vlgmr.msra.gmra.mrb[4].mxu0 %vm558_vm7, %v655_v36 }
 0x32f   :  { %v744_v38 = vpop.f32.mrb[4].mxu0 }
 0x330   :  { %v745_v39 = vadd.f32 %v779_v37, %v744_v38  ;;  %v938_v40 = vpop.f32.mrb[5].mxu0 }
 0x332   :  { %v748_v41 = vmax.f32 %v745_v39, 0.0 }
 0x334   :  { %749 = vst [vmem:[#allocation2] sm:$0x3] %v748_v41 }
 0x335   :  { %1043 = shalt.err (!%p1040_p4)
}
 0x336   :  { %s1044_s11 = scalar_lea.hbm %s1347_s8, 32 }
 0x337   :  { %p1045_p5 = scmp.ne.s32.totalorder %s1347_s8, %s1044_s11  ;;  %p1048_p6 = scmp.lt.u32.totalorder %s1044_s11, %s1347_s8 }
 0x339   :  { %p1050_p7 = pnand %p1048_p6, %p1045_p5 }
 0x33b   :  { %1053 = shalt.err (!%p1050_p7)
}
 0x33c   :  { %759 = dma.vmem_to_hbm [thread:$0]  %s757_s9, 32, %s1347_s8, [#allocation3]  }
 0x33d   :  { %1054 = dma.done.wait [#allocation3], 32  }
 0x33e   :  { %1055 = vsyncadd [#allocation3], 4294967264 }
 0x33f   :  { %763 = vsyncpa [#allocation3], 1 }

</bundles_post_ra>
